<compile_context>
chip_gen: v7x
topology: tpu7x:2x2x1
jax: 0.10.0
libtpu: 0.0.40
codegen_flags: <defaults>
</compile_context>

<pallas_src>
import functools
import math

import jax
import jax.numpy as jnp
from jax.experimental import pallas as pl
from jax.experimental.pallas import tpu as pltpu

_GELU_C = math.sqrt(2.0 / math.pi)


def _gelu_new(x):
    return 0.5 * x * (1.0 + jnp.tanh(_GELU_C * (x + 0.044715 * (x * x * x))))


@functools.lru_cache(maxsize=1)
def _vmem_cap_bytes():
    """Per-chip VMEM budget with headroom for compiler scratch / pipelining."""
    try:
        phys = int(pltpu.get_tpu_info().vmem_capacity_bytes)
        return int(min(phys - 16 * 2**20, 100 * 2**20))
    except Exception:
        return 48 * 2**20  # safe on v5e/v6e (128 MiB) and v7x (64 MiB / TC)


def _round_up(x, mult):
    return mult * pl.cdiv(x, mult)


# ----------------------------------------------------------------------------
# Dense projection kernel (GPT-2 Conv1D / Linear):  y = act(x @ W [+ b])
# ----------------------------------------------------------------------------
def _dense_kernel(x_ref, w_ref, *rest, activation, has_bias):
    if has_bias:
        b_ref, o_ref, acc_ref = rest
    else:
        b_ref, (o_ref, acc_ref) = None, rest

    k = pl.program_id(2)

    @pl.when(k == 0)
    def _():
        acc_ref[...] = jnp.zeros_like(acc_ref)

    # bf16 x bf16 on the MXU, f32 accumulation (operands already arrive bf16).
    acc_ref[...] += jnp.dot(x_ref[...], w_ref[...],
                            preferred_element_type=jnp.float32)

    @pl.when(k == pl.num_programs(2) - 1)
    def _():
        y = acc_ref[...]
        if has_bias:
            y = y + b_ref[...]              # bias pre-cast to f32, (1, tn)
        if activation == "gelu_new":
            y = _gelu_new(y)
        o_ref[...] = y.astype(o_ref.dtype)


def _pick_tk(k_dim):
    """Reduction tile: must divide K exactly and be a 128 multiple (or full K)."""
    if k_dim <= 2048:
        return k_dim
    for cand in range(1024, 127, -128):
        if k_dim % cand == 0:
            return cand
    # TODO(synk): exotic hidden sizes with no 128-multiple divisor fall back to
    # the full K stripe; fine for standard GPT-2 widths.
    return k_dim


def dense(x, weight, bias=None, *, activation=None, out_dtype=jnp.float32):
    """GPT-2 Conv1D semantics: y = x.view(-1, nx) @ W(nx, nf) [+ b], reshaped."""
    nx, nf = weight.shape
    orig_shape = x.shape
    assert orig_shape[-1] == nx
    m = 1
    for d in orig_shape[:-1]:
        m *= d
    x2 = x.reshape(m, nx)
    if x2.dtype != jnp.bfloat16:
        x2 = x2.astype(jnp.bfloat16)          # single cast in the wrapper
    w = weight if weight.dtype == jnp.bfloat16 else weight.astype(jnp.bfloat16)

    # Row tile: large enough to feed the MXU / amortize per-step overhead.
    if m <= 512:
        tm = m
    elif m < 4096:
        tm = 512
    else:
        tm = 1024
    # N tile: keep blocks 128-lane dense; split large nf.
    if nf <= 2048:
        tn = nf
    elif nf <= 4096:
        tn = _round_up(pl.cdiv(nf, 2), 128)
    else:
        tn = 2048
    # Guarantee >=2 blocks along a parallel axis so both v7x TensorCores work.
    if pl.cdiv(m, tm) == 1 and pl.cdiv(nf, tn) == 1 and nf >= 256:
        tn = _round_up(pl.cdiv(nf, 2), 128)
    tk = _pick_tk(nx)

    grid = (pl.cdiv(m, tm), pl.cdiv(nf, tn), nx // tk)

    has_bias = bias is not None
    operands = [x2, w]
    in_specs = [
        pl.BlockSpec((tm, tk), lambda i, j, k: (i, k)),   # x rows (bf16)
        pl.BlockSpec((tk, tn), lambda i, j, k: (k, j)),   # weight tile (bf16)
    ]
    if has_bias:
        operands.append(bias.reshape(1, nf).astype(jnp.float32))
        in_specs.append(pl.BlockSpec((1, tn), lambda i, j, k: (0, j)))

    out_bytes = jnp.dtype(out_dtype).itemsize
    est = (2 * (tm * tk * 2 + tk * tn * 2 + tm * tn * out_bytes)
           + tm * tn * 4 + (2 * tn * 4 if has_bias else 0))
    vmem_limit = int(min(_vmem_cap_bytes(), max(32 * 2**20, est + 16 * 2**20)))

    # HBM traffic including K/N re-streaming of x and W across the grid.
    cost = pl.CostEstimate(
        flops=int(2 * m * nx * nf),
        transcendentals=int(m * nf if activation == "gelu_new" else 0),
        bytes_accessed=int(grid[1] * m * nx * 2 + grid[0] * nx * nf * 2
                           + (nf * 4 if has_bias else 0) + m * nf * out_bytes),
    )

    out = pl.pallas_call(
        functools.partial(_dense_kernel, activation=activation,
                          has_bias=has_bias),
        out_shape=jax.ShapeDtypeStruct((m, nf), out_dtype),
        grid_spec=pltpu.PrefetchScalarGridSpec(
            num_scalar_prefetch=0,
            grid=grid,
            in_specs=in_specs,
            out_specs=pl.BlockSpec((tm, tn), lambda i, j, k: (i, j)),
            scratch_shapes=[pltpu.VMEM((tm, tn), jnp.float32)],
        ),
        compiler_params=pltpu.CompilerParams(
            dimension_semantics=("parallel", "parallel", "arbitrary"),
            vmem_limit_bytes=vmem_limit,
        ),
        cost_estimate=cost,
    )(*operands)

    return out.reshape(orig_shape[:-1] + (nf,))


# ----------------------------------------------------------------------------
# LayerNorm kernel
# ----------------------------------------------------------------------------
def _layernorm_kernel(x_ref, g_ref, b_ref, o_ref, *, eps):
    x = x_ref[...].astype(jnp.float32)
    mu = jnp.mean(x, axis=-1, keepdims=True)
    xc = x - mu
    var = jnp.mean(xc * xc, axis=-1, keepdims=True)
    y = xc * jax.lax.rsqrt(var + eps)
    o_ref[...] = (y * g_ref[...] + b_ref[...]).astype(o_ref.dtype)


def layernorm(x, gamma, beta, *, eps=1e-5, out_dtype=None):
    orig_shape = x.shape
    d = orig_shape[-1]
    m = x.size // d
    out_dtype = x.dtype if out_dtype is None else out_dtype
    x2 = x.reshape(m, d)
    tm = m if m <= 1024 else 512
    g2 = gamma.reshape(1, d).astype(jnp.float32)
    b2 = beta.reshape(1, d).astype(jnp.float32)
    est = (2 * tm * d * (x2.dtype.itemsize + jnp.dtype(out_dtype).itemsize)
           + 4 * d * 4)
    out = pl.pallas_call(
        functools.partial(_layernorm_kernel, eps=eps),
        out_shape=jax.ShapeDtypeStruct((m, d), out_dtype),
        grid_spec=pltpu.PrefetchScalarGridSpec(
            num_scalar_prefetch=0,
            grid=(pl.cdiv(m, tm),),
            in_specs=[
                pl.BlockSpec((tm, d), lambda i: (i, 0)),
                pl.BlockSpec((1, d), lambda i: (0, 0)),
                pl.BlockSpec((1, d), lambda i: (0, 0)),
            ],
            out_specs=pl.BlockSpec((tm, d), lambda i: (i, 0)),
        ),
        compiler_params=pltpu.CompilerParams(
            dimension_semantics=("parallel",),
            vmem_limit_bytes=int(min(_vmem_cap_bytes(),
                                     max(16 * 2**20, 4 * est))),
        ),
    )(x2, g2, b2)
    return out.reshape(orig_shape)


# ----------------------------------------------------------------------------
# Flash-style causal self-attention (online softmax, no score materialization)
# ----------------------------------------------------------------------------
def _flash_attn_kernel(q_ref, k_ref, v_ref, o_ref, m_sc, l_sc, acc_sc,
                       *, scale, tq, tk):
    kv = pl.program_id(2)

    @pl.when(kv == 0)
    def _():
        m_sc[...] = jnp.full_like(m_sc, -jnp.inf)
        l_sc[...] = jnp.zeros_like(l_sc)
        acc_sc[...] = jnp.zeros_like(acc_sc)

    q_start = pl.program_id(1) * tq
    k_start = kv * tk

    # Skip KV tiles lying entirely above the causal diagonal for this q tile.
    @pl.when(k_start <= q_start + tq - 1)
    def _():
        # Fold 1/sqrt(dk) into q (tq*dk multiplies instead of tq*tk).
        q = (q_ref[0].astype(jnp.float32) * scale).astype(jnp.bfloat16)
        k = k_ref[0]
        v = v_ref[0]
        s = jax.lax.dot_general(q, k, (((1,), (1,)), ((), ())),
                                preferred_element_type=jnp.float32)
        row = q_start + jax.lax.broadcasted_iota(jnp.int32, s.shape, 0)
        col = k_start + jax.lax.broadcasted_iota(jnp.int32, s.shape, 1)
        s = jnp.where(col <= row, s, -1e30)         # causal look-ahead mask

        m_prev = m_sc[...]
        m_new = jnp.maximum(m_prev, jnp.max(s, axis=-1, keepdims=True))
        alpha = jnp.exp(m_prev - m_new)
        p = jnp.exp(s - m_new)
        l_sc[...] = alpha * l_sc[...] + jnp.sum(p, axis=-1, keepdims=True)
        acc_sc[...] = alpha * acc_sc[...] + jax.lax.dot_general(
            p.astype(jnp.bfloat16), v, (((1,), (0,)), ((), ())),
            preferred_element_type=jnp.float32)
        m_sc[...] = m_new

    @pl.when(kv == pl.num_programs(2) - 1)
    def _():
        inv_l = pl.reciprocal(l_sc[...], approx=True)
        o_ref[0] = (acc_sc[...] * inv_l).astype(o_ref.dtype)


def causal_attention(q, k, v):
    """q, k, v: (B, H, S, dk) bf16 -> context (B, H, S, dk) bf16."""
    b, h, s, dk = q.shape
    scale = 1.0 / math.sqrt(dk)
    bh = b * h
    q3 = q.reshape(bh, s, dk).astype(jnp.bfloat16)
    k3 = k.reshape(bh, s, dk).astype(jnp.bfloat16)
    v3 = v.reshape(bh, s, dk).astype(jnp.bfloat16)

    tq = s if s <= 256 else 256
    tk = s if s <= 512 else 512
    grid = (bh, pl.cdiv(s, tq), pl.cdiv(s, tk))

    est = (2 * (tq * dk * 2 + 2 * tk * dk * 2 + tq * dk * 2)
           + tq * (dk + 2) * 4 + 4 * tq * tk * 4)
    vmem_limit = int(min(_vmem_cap_bytes(), max(32 * 2**20, est + 16 * 2**20)))

    cost = pl.CostEstimate(
        flops=int(4 * bh * s * s * dk),
        transcendentals=int(bh * s * s),
        bytes_accessed=int(4 * bh * s * dk * 2),
    )

    out = pl.pallas_call(
        functools.partial(_flash_attn_kernel, scale=scale, tq=tq, tk=tk),
        out_shape=jax.ShapeDtypeStruct((bh, s, dk), jnp.bfloat16),
        grid_spec=pltpu.PrefetchScalarGridSpec(
            num_scalar_prefetch=0,
            grid=grid,
            in_specs=[
                pl.BlockSpec((1, tq, dk), lambda bhi, qi, kvi: (bhi, qi, 0)),
                pl.BlockSpec((1, tk, dk), lambda bhi, qi, kvi: (bhi, kvi, 0)),
                pl.BlockSpec((1, tk, dk), lambda bhi, qi, kvi: (bhi, kvi, 0)),
            ],
            out_specs=pl.BlockSpec((1, tq, dk), lambda bhi, qi, kvi: (bhi, qi, 0)),
            scratch_shapes=[
                pltpu.VMEM((tq, 1), jnp.float32),    # running max m
                pltpu.VMEM((tq, 1), jnp.float32),    # running sum l
                pltpu.VMEM((tq, dk), jnp.float32),   # output accumulator
            ],
        ),
        compiler_params=pltpu.CompilerParams(
            dimension_semantics=("parallel", "parallel", "arbitrary"),
            vmem_limit_bytes=vmem_limit,
        ),
        cost_estimate=cost,
    )(q3, k3, v3)
    return out.reshape(b, h, s, dk)


# ----------------------------------------------------------------------------
# GPT-2 model (functional)
# ----------------------------------------------------------------------------
def _split_heads(x, num_heads):
    b, s, d = x.shape
    dk = d // num_heads
    # TODO(synk): the head split/merge transposes could be folded into the
    # attention BlockSpec index_maps (head grid over the fused qkv); kept in XLA
    # because dk is not a 128 multiple (minor-dim blocking constraint).
    return x.reshape(b, s, num_heads, dk).transpose(0, 2, 1, 3)


def decoder_layer(x, p, *, num_heads):
    b, s, d = x.shape
    h = layernorm(x, p["ln1_g"], p["ln1_b"], out_dtype=jnp.bfloat16)
    qkv = dense(h, p["wk_w"], p["wk_b"], out_dtype=jnp.bfloat16)
    q, k, v = jnp.split(qkv, 3, axis=-1)
    ctx = causal_attention(_split_heads(q, num_heads),
                           _split_heads(k, num_heads),
                           _split_heads(v, num_heads))
    ctx = ctx.transpose(0, 2, 1, 3).reshape(b, s, d)
    x = x + dense(ctx, p["wo_w"], p["wo_b"], out_dtype=jnp.float32)
    h = layernorm(x, p["ln2_g"], p["ln2_b"], out_dtype=jnp.bfloat16)
    h = dense(h, p["fc1_w"], p["fc1_b"], activation="gelu_new",
              out_dtype=jnp.bfloat16)
    x = x + dense(h, p["fc2_w"], p["fc2_b"], out_dtype=jnp.float32)
    # Per-layer attention probabilities (returned by the PyTorch layer but
    # discarded by GPT2.forward) are intentionally not materialized.
    return x


def gpt2_forward(params, input_ids, *, num_heads):
    # TODO(synk): embedding gather (wte/wpe lookup) has no clean rectangular
    # BlockSpec; kept as a plain JAX gather.
    tok = jnp.take(params["wte"], input_ids, axis=0)
    pos = params["wpe"][: input_ids.shape[1]][None, :, :]
    x = (tok + pos).astype(jnp.float32)
    for lp in params["layers"]:
        x = decoder_layer(x, lp, num_heads=num_heads)
    h = layernorm(x, params["lnf_g"], params["lnf_b"], out_dtype=jnp.bfloat16)

    # Bias-free LM head; pad vocab to a 128 multiple for lane-dense stores.
    head_w = params["head_w"]
    vocab = head_w.shape[1]
    vocab_padded = _round_up(vocab, 128)
    if vocab_padded != vocab:
        head_w = jnp.pad(head_w, ((0, 0), (0, vocab_padded - vocab)))
    logits = dense(h, head_w, bias=None, out_dtype=jnp.float32)
    if vocab_padded != vocab:
        logits = logits[..., :vocab]
    return logits


def init_gpt2_params(key, *, vocab_size, max_seq_len, num_layers, d_embed,
                     d_model, num_heads, intermediate_size):
    assert d_model == d_embed and d_model % num_heads == 0
    keys = jax.random.split(key, 4 + num_layers)

    def conv1d_params(k, nx, nf):
        w = (0.02 * jax.random.normal(k, (nx, nf), jnp.float32)).astype(jnp.bfloat16)
        return w, jnp.zeros((nf,), jnp.float32)

    params = {
        "wte": 0.02 * jax.random.normal(keys[0], (vocab_size, d_embed), jnp.float32),
        "wpe": 0.02 * jax.random.normal(keys[1], (max_seq_len, d_embed), jnp.float32),
        "lnf_g": jnp.ones((d_embed,), jnp.float32),
        "lnf_b": jnp.zeros((d_embed,), jnp.float32),
        "head_w": (0.02 * jax.random.normal(keys[2], (d_embed, vocab_size),
                                            jnp.float32)).astype(jnp.bfloat16),
        "layers": [],
    }
    for i in range(num_layers):
        lk = jax.random.split(keys[4 + i], 4)
        wk_w, wk_b = conv1d_params(lk[0], d_embed, 3 * d_embed)
        wo_w, wo_b = conv1d_params(lk[1], d_embed, d_embed)
        f1_w, f1_b = conv1d_params(lk[2], d_embed, intermediate_size)
        f2_w, f2_b = conv1d_params(lk[3], intermediate_size, d_embed)
        params["layers"].append({
            "ln1_g": jnp.ones((d_embed,), jnp.float32),
            "ln1_b": jnp.zeros((d_embed,), jnp.float32),
            "ln2_g": jnp.ones((d_embed,), jnp.float32),
            "ln2_b": jnp.zeros((d_embed,), jnp.float32),
            "wk_w": wk_w, "wk_b": wk_b,
            "wo_w": wo_w, "wo_b": wo_b,
            "fc1_w": f1_w, "fc1_b": f1_b,
            "fc2_w": f2_w, "fc2_b": f2_b,
        })
    return params


# ----------------------------------------------------------------------------
# Pure-JAX reference (mirrors the kernel precision choices)
# ----------------------------------------------------------------------------
def _ref_dense(x, w, b=None, activation=None, out_dtype=jnp.float32):
    orig = x.shape
    y = jnp.dot(x.reshape(-1, orig[-1]).astype(jnp.bfloat16),
                w.astype(jnp.bfloat16), preferred_element_type=jnp.float32)
    if b is not None:
        y = y + b.astype(jnp.float32)
    if activation == "gelu_new":
        y = _gelu_new(y)
    return y.reshape(orig[:-1] + (w.shape[1],)).astype(out_dtype)


def _ref_layernorm(x, g, b, eps=1e-5, out_dtype=jnp.float32):
    xf = x.astype(jnp.float32)
    mu = jnp.mean(xf, axis=-1, keepdims=True)
    xc = xf - mu
    var = jnp.mean(xc * xc, axis=-1, keepdims=True)
    return (xc * jax.lax.rsqrt(var + eps) * g + b).astype(out_dtype)


def _ref_attention(q, k, v):
    dk = q.shape[-1]
    scale = 1.0 / math.sqrt(dk)
    qs = (q.astype(jnp.float32) * scale).astype(jnp.bfloat16)
    s = jnp.einsum("bhqd,bhkd->bhqk", qs, k.astype(jnp.bfloat16),
                   preferred_element_type=jnp.float32)
    seq = s.shape[-1]
    row = jax.lax.broadcasted_iota(jnp.int32, (seq, seq), 0)
    col = jax.lax.broadcasted_iota(jnp.int32, (seq, seq), 1)
    s = jnp.where((col <= row)[None, None], s, -1e30)
    mx = jnp.max(s, axis=-1, keepdims=True)
    p = jnp.exp(s - mx)
    l = jnp.sum(p, axis=-1, keepdims=True)
    o = jnp.einsum("bhqk,bhkd->bhqd", p.astype(jnp.bfloat16),
                   v.astype(jnp.bfloat16), preferred_element_type=jnp.float32)
    return (o / l).astype(jnp.bfloat16)


def _ref_forward(params, input_ids, *, num_heads):
    tok = jnp.take(params["wte"], input_ids, axis=0)
    pos = params["wpe"][: input_ids.shape[1]][None, :, :]
    x = (tok + pos).astype(jnp.float32)
    for p in params["layers"]:
        b, s, d = x.shape
        h = _ref_layernorm(x, p["ln1_g"], p["ln1_b"], out_dtype=jnp.bfloat16)
        qkv = _ref_dense(h, p["wk_w"], p["wk_b"], out_dtype=jnp.bfloat16)
        q, k, v = jnp.split(qkv, 3, axis=-1)
        ctx = _ref_attention(_split_heads(q, num_heads),
                             _split_heads(k, num_heads),
                             _split_heads(v, num_heads))
        ctx = ctx.transpose(0, 2, 1, 3).reshape(b, s, d)
        x = x + _ref_dense(ctx, p["wo_w"], p["wo_b"], out_dtype=jnp.float32)
        h = _ref_layernorm(x, p["ln2_g"], p["ln2_b"], out_dtype=jnp.bfloat16)
        h = _ref_dense(h, p["fc1_w"], p["fc1_b"], activation="gelu_new",
                       out_dtype=jnp.bfloat16)
        x = x + _ref_dense(h, p["fc2_w"], p["fc2_b"], out_dtype=jnp.float32)
    x = _ref_layernorm(x, params["lnf_g"], params["lnf_b"], out_dtype=jnp.bfloat16)
    return _ref_dense(x, params["head_w"], None, out_dtype=jnp.float32)


if __name__ == "__main__":
    vocab_size, max_seq_len = 96, 16
    num_layers, d_embed, d_model, num_heads, intermediate = 2, 32, 32, 4, 128
    batch, seq = 2, 8

    key = jax.random.PRNGKey(0)
    kp, ki = jax.random.split(key)
    params = init_gpt2_params(kp, vocab_size=vocab_size, max_seq_len=max_seq_len,
                              num_layers=num_layers, d_embed=d_embed,
                              d_model=d_model, num_heads=num_heads,
                              intermediate_size=intermediate)
    input_ids = jax.random.randint(ki, (batch, seq), 0, vocab_size)

    logits = gpt2_forward(params, input_ids, num_heads=num_heads)
    logits = jax.block_until_ready(logits)

    assert logits.shape == (batch, seq, vocab_size)
    assert bool(jnp.all(jnp.isfinite(logits)))

    logits_ref = _ref_forward(params, input_ids, num_heads=num_heads)
    assert jnp.allclose(logits, logits_ref, atol=5e-3, rtol=2e-2), (
        float(jnp.max(jnp.abs(logits - logits_ref))))

    print("KERNEL_OK")
</pallas_src>

<mosaic_0001>
module attributes {stable_mosaic.version = 11 : i64} {
  func.func @_layernorm_kernel(%arg0: i32, %arg1: memref<16x32xf32, #tpu.memory_space<vmem>>, %arg2: memref<1x32xf32, #tpu.memory_space<vmem>>, %arg3: memref<1x32xf32, #tpu.memory_space<vmem>>, %arg4: memref<16x32xbf16, #tpu.memory_space<vmem>>) attributes {dimension_semantics = [#tpu.dimension_semantics<parallel>], iteration_bounds = array<i64: 1>, scalar_prefetch = 0 : i64, scratch_operands = 0 : i64, tpu.core_type = #tpu.core_type<tc>, window_params = [{transform_indices = @transform_0, window_bounds = array<i64: 16, 32>}, {pipeline_mode = #tpu.pipeline_mode<synchronous>, transform_indices = @transform_1, window_bounds = array<i64: 1, 32>}, {pipeline_mode = #tpu.pipeline_mode<synchronous>, transform_indices = @transform_2, window_bounds = array<i64: 1, 32>}, {transform_indices = @transform_3, window_bounds = array<i64: 16, 32>}]} {
    %c0 = arith.constant 0 : index
    %c0_0 = arith.constant 0 : index
    %0 = vector.load %arg1[%c0, %c0_0] : memref<16x32xf32, #tpu.memory_space<vmem>>, vector<16x32xf32>
    %cst = arith.constant dense<0.000000e+00> : vector<16xf32>
    %1 = vector.multi_reduction <add>, %0, %cst [1] : vector<16x32xf32> to vector<16xf32>
    %2 = vector.shape_cast %1 : vector<16xf32> to vector<16x1xf32>
    %cst_1 = arith.constant 3.200000e+01 : f32
    %3 = vector.broadcast %cst_1 : f32 to vector<16x1xf32>
    %4 = arith.divf %2, %3 : vector<16x1xf32>
    %5 = vector.broadcast %4 : vector<16x1xf32> to vector<16x32xf32>
    %6 = arith.subf %0, %5 : vector<16x32xf32>
    %7 = arith.mulf %6, %6 : vector<16x32xf32>
    %cst_2 = arith.constant dense<0.000000e+00> : vector<16xf32>
    %8 = vector.multi_reduction <add>, %7, %cst_2 [1] : vector<16x32xf32> to vector<16xf32>
    %9 = vector.shape_cast %8 : vector<16xf32> to vector<16x1xf32>
    %cst_3 = arith.constant 3.200000e+01 : f32
    %10 = vector.broadcast %cst_3 : f32 to vector<16x1xf32>
    %11 = arith.divf %9, %10 : vector<16x1xf32>
    %cst_4 = arith.constant 9.99999974E-6 : f32
    %12 = vector.broadcast %cst_4 : f32 to vector<16x1xf32>
    %13 = arith.addf %11, %12 : vector<16x1xf32>
    %14 = math.rsqrt %13 : vector<16x1xf32>
    %15 = vector.broadcast %14 : vector<16x1xf32> to vector<16x32xf32>
    %16 = arith.mulf %6, %15 : vector<16x32xf32>
    %c0_5 = arith.constant 0 : index
    %c0_6 = arith.constant 0 : index
    %17 = vector.load %arg2[%c0_5, %c0_6] : memref<1x32xf32, #tpu.memory_space<vmem>>, vector<1x32xf32>
    %18 = vector.broadcast %17 : vector<1x32xf32> to vector<16x32xf32>
    %19 = arith.mulf %16, %18 : vector<16x32xf32>
    %c0_7 = arith.constant 0 : index
    %c0_8 = arith.constant 0 : index
    %20 = vector.load %arg3[%c0_7, %c0_8] : memref<1x32xf32, #tpu.memory_space<vmem>>, vector<1x32xf32>
    %21 = vector.broadcast %20 : vector<1x32xf32> to vector<16x32xf32>
    %22 = arith.addf %19, %21 : vector<16x32xf32>
    %23 = arith.truncf %22 : vector<16x32xf32> to vector<16x32xbf16>
    %c0_9 = arith.constant 0 : index
    %c0_10 = arith.constant 0 : index
    %24 = vector.load %arg4[%c0_9, %c0_10] : memref<16x32xbf16, #tpu.memory_space<vmem>>, vector<16x32xbf16>
    tpu.vector_store %arg4[%c0_9, %c0_10], %23 {strides = array<i32>} : memref<16x32xbf16, #tpu.memory_space<vmem>>, vector<16x32xbf16>,
    return
  }
  func.func @transform_0(%arg0: i32) -> (i32, i32) {
    %c0_i32 = arith.constant 0 : i32
    %c0_i32_0 = arith.constant 0 : i32
    return %arg0, %c0_i32 : i32, i32
  }
  func.func @transform_1(%arg0: i32) -> (i32, i32) {
    %c0_i32 = arith.constant 0 : i32
    %c0_i32_0 = arith.constant 0 : i32
    %c0_i32_1 = arith.constant 0 : i32
    return %c0_i32, %c0_i32_0 : i32, i32
  }
  func.func @transform_2(%arg0: i32) -> (i32, i32) {
    %c0_i32 = arith.constant 0 : i32
    %c0_i32_0 = arith.constant 0 : i32
    %c0_i32_1 = arith.constant 0 : i32
    return %c0_i32, %c0_i32_0 : i32, i32
  }
  func.func @transform_3(%arg0: i32) -> (i32, i32) {
    %c0_i32 = arith.constant 0 : i32
    %c0_i32_0 = arith.constant 0 : i32
    return %arg0, %c0_i32 : i32, i32
  }
}

</mosaic_0001>

<bundles_post_ra>
// kernel: tpu_custom_call.1
= control target key start
LH: loop header
LB: loop body
LE: loop exit
PB: predicated region body
PF: predicated region fallthrough
CT: control target
= control target key end

     0   :  { %8 = vsyncpa [#allocation3], 0  ;;  %s229_s0 = inlined_call_operand.hbm [shape: f32[16,32], index: 0, kind: input, shape index: {}]   ;;  %s230_s1 = inlined_call_operand.vmem [shape: f32[1,32], index: 1, kind: input, shape index: {}]   ;;  %s231_s2 = inlined_call_operand.vmem [shape: f32[1,32], index: 2, kind: input, shape index: {}]   ;;  %s232_s3 = inlined_call_operand.hbm [shape: bf16[16,32], index: 3, kind: output, shape index: {}]  }
   0x1   :  { %9 = vsyncpa [#allocation4], 0  ;;  %s169_s12 = smov [#allocation2]   ;;  %s121_s16 = scalar_lea.hbm %s229_s0, 256 }
   0x2   :  { %s15_s13 = sshll.u32 %s169_s12, 4  ;;  %p122_p0 = scmp.ne.s32.totalorder %s229_s0, %s121_s16  ;;  %s16_s13 = int_to_ptr.vmem [resolvable:$true] %s15_s13 }
   0x3   :  { %p125_p1 = scmp.lt.u32.totalorder %s121_s16, %s229_s0 }
   0x5   :  { %p127_p2 = pnand %p125_p1, %p122_p0 }
   0x7   :  { %130 = shalt.err (!%p127_p2)
}
   0x8   :  { %s131_s21 = scalar_lea.vmem %s16_s13, 256  ;;  %p136_p4 = scmp.lt.s32.totalorder %s16_s13, %s16_s13 }
   0x9   :  { %p132_p3 = scmp.ne.s32.totalorder %s16_s13, %s131_s21  ;;  %p137_p5 = scmp.lt.s32.totalorder %s131_s21, %s131_s21 }
   0xb   :  { %p138_p6 = por %p137_p5, %p136_p4 }
   0xd   :  { %p139_p7 = pnand %p138_p6, %p132_p3 }
   0xf   :  { %142 = shalt.err (!%p139_p7)
}
  0x10   :  { %s170_s22 = smov 128   ;;  %s171_s23 = smov 8  }
  0x11   :  { %21 = dma.hbm_to_vmem [thread:$0]  %s229_s0, 256, %s16_s13, [#allocation3], %s170_s22, %s170_s22, %s171_s23  }
  0x12   :  { %165 = dma.done.wait [#allocation3], 256  }
  0x13   :  { %166 = vsyncadd [#allocation3], 4294967040  ;;  %vm31_vm0 = vcmask 261120   ;;  %v29_v0 = vld [vmem:[#allocation2] sm:$0xff]  ;;  %v30_v1 = vld [vmem:[#allocation2 + $0x8] sm:$0xff]  ;;  %vm85_vm1 = vcmask 257024  }
  0x14   :  { %v32_v2 = vsel %vm31_vm0, %v29_v0, 0.0  ;;  %v35_v3 = vsel %vm31_vm0, %v30_v1, 0.0  ;;  %v105_v21 = vld [vmem:[%s230_s1] ss:$0 sm:$0xff]  ;;  %s172_s29 = smov [#allocation5]  }
  0x15   :  { %33 = vadd.xlane.f32.xlu0 %v32_v2  ;;  %v106_v23 = vld [vmem:[%s231_s2] ss:$0 sm:$0xff]  ;;  %s93_s30 = sshll.u32 %s172_s29, 4  ;;  %s94_s30 = int_to_ptr.vmem [resolvable:$true] %s93_s30 }
  0x16   :  { %s143_s1 = scalar_lea.vmem %s94_s30, 128  ;;  %p148_p9 = scmp.lt.s32.totalorder %s94_s30, %s94_s30 }
  0x17   :  { %p144_p8 = scmp.ne.s32.totalorder %s94_s30, %s143_s1  ;;  %p149_p10 = scmp.lt.s32.totalorder %s143_s1, %s143_s1 }
  0x19   :  { %36 = vadd.xlane.f32.xlu0 %v35_v3  ;;  %p150_p11 = por %p149_p10, %p148_p9 }
  0x1b   :  { %p151_p12 = pnand %p150_p11, %p144_p8 }
  0xa2   :  { %v34_v4 = vpop.xlane.xlu0 %33 }
  0xa3   :  { %v39_v5 = vmul.f32 0.03125, %v34_v4 }
  0xa5   :  { %v41_v6 = vsub.f32 %v29_v0, %v39_v5 }
  0xa6   :  { %v37_v7 = vpop.xlane.xlu0 %36 }
  0xa7   :  { %v40_v8 = vmul.f32 0.03125, %v37_v7  ;;  %v43_v9 = vmul.f32 %v41_v6, %v41_v6 }
  0xa9   :  { %v42_v10 = vsub.f32 %v30_v1, %v40_v8  ;;  %v45_v11 = vsel %vm31_vm0, %v43_v9, 0.0 }
  0xaa   :  { %46 = vadd.xlane.f32.xlu1 %v45_v11 }
  0xab   :  { %v44_v12 = vmul.f32 %v42_v10, %v42_v10 }
  0xad   :  { %v48_v13 = vsel %vm31_vm0, %v44_v12, 0.0 }
  0xae   :  { %49 = vadd.xlane.f32.xlu1 %v48_v13 }
 0x137   :  { %v47_v14 = vpop.xlane.xlu1 %46 }
 0x138   :  { %v51_v15 = vmul.f32 0.03125, %v47_v14 }
 0x13a   :  { %v53_v16 = vadd.f32 1e-05, %v51_v15 }
 0x13b   :  { %v50_v17 = vpop.xlane.xlu1 %49 }
 0x13c   :  { %117 = vrsqrt.f32 %v53_v16  ;;  %v52_v18 = vmul.f32 0.03125, %v50_v17 }
 0x13e   :  { %v54_v19 = vadd.f32 1e-05, %v52_v18 }
 0x140   :  { %119 = vrsqrt.f32 %v54_v19 }
 0x146   :  { %v118_v20 = vpop.eup %117 }
 0x147   :  { %v57_v22 = vmul.f32 %v118_v20, %v41_v6 }
 0x149   :  { %v66_v24 = vmul.f32 %v105_v21, %v57_v22 }
 0x14a   :  { %v120_v25 = vpop.eup %119 }
 0x14b   :  { %v58_v26 = vmul.f32 %v120_v25, %v42_v10  ;;  %v75_v27 = vadd.f32 %v106_v23, %v66_v24 }
 0x14d   :  { %v67_v28 = vmul.f32 %v105_v21, %v58_v26  ;;  %v109_v29 = vpack.c.bf16 %v75_v27, %v75_v27 }
 0x14f   :  { %v76_v30 = vadd.f32 %v106_v23, %v67_v28  ;;  %86 = vst.msk [vmem:[#allocation5] sm:$0xf] %vm85_vm1, %v109_v29 }
 0x151   :  { %v110_v31 = vpack.c.bf16 %v76_v30, %v76_v30 }
 0x153   :  { %87 = vst.msk [vmem:[#allocation5 + $0x4] sm:$0xf] %vm85_vm1, %v110_v31 }
 0x154   :  { %154 = shalt.err (!%p151_p12)
}
 0x155   :  { %s155_s5 = scalar_lea.hbm %s232_s3, 128 }
 0x156   :  { %p156_p13 = scmp.ne.s32.totalorder %s232_s3, %s155_s5  ;;  %p159_p0 = scmp.lt.u32.totalorder %s155_s5, %s232_s3 }
 0x158   :  { %p161_p1 = pnand %p159_p0, %p156_p13 }
 0x15a   :  { %164 = shalt.err (!%p161_p1)
}
 0x15b   :  { %s173_s10 = smov 64   ;;  %s174_s11 = smov 4  }
 0x15c   :  { %99 = dma.vmem_to_hbm [thread:$0]  %s94_s30, 128, %s232_s3, [#allocation4], %s173_s10, %s173_s10, %s174_s11  }
 0x15d   :  { %167 = dma.done.wait [#allocation4], 128  }
 0x15e   :  { %168 = vsyncadd [#allocation4], 4294967168 }
 0x15f   :  { %103 = vsyncpa [#allocation3], 1 }
 0x160   :  { %104 = vsyncpa [#allocation4], 1 }

</bundles_post_ra>
